<compile_context>
chip_gen: v7x
topology: tpu7x:2x2x1
jax: 0.10.0
libtpu: 0.0.40
codegen_flags: <defaults>
</compile_context>

<pallas_src>
import functools
import math

import jax
import jax.numpy as jnp
from jax import lax
from jax.experimental import pallas as pl
from jax.experimental.pallas import tpu as pltpu


_LANE = 128
_SUBLANE_PACK = {4: 8, 2: 16, 1: 32}  # itemsize -> sublane pack


def _round_up(x, m):
    return ((x + m - 1) // m) * m


def _rmsnorm_kernel(x_ref, w_ref, o_ref, *, eps, true_h):
    # x_ref: (block_rows, H_pad) in the input dtype; w_ref: (1, H_pad) float32 param.
    x = x_ref[...]
    xf = x.astype(jnp.float32)
    # variance = mean(x^2) over the *unpadded* hidden dim, computed in f32 (matches torch).
    # Padded lanes are zero, so sum-of-squares is unaffected; divide by the true H.
    var = jnp.sum(xf * xf, axis=-1, keepdims=True) * (1.0 / true_h)
    inv = lax.rsqrt(var + eps)
    # torch: (x * rsqrt(var+eps)) then cast back to input dtype
    y = (xf * inv).astype(x.dtype)
    # torch: weight.to(input_dtype) * hidden_states
    o_ref[...] = w_ref[...].astype(x.dtype) * y


def biasless_layer_norm(x, weight, eps=1e-6, target_block_bytes=4 * 1024 * 1024):
    """x: (..., H), weight: (H,) float32. Returns same shape/dtype as x."""
    orig_shape = x.shape
    H = orig_shape[-1]
    rows = math.prod(orig_shape[:-1]) if len(orig_shape) > 1 else 1
    itemsize = jnp.dtype(x.dtype).itemsize
    pack = _SUBLANE_PACK.get(itemsize, 8)

    # Lane-dense hidden dim: pad H to a multiple of 128 so stores are full-width (no vst.msk).
    H_pad = _round_up(H, _LANE)

    # Row tile: ~target_block_bytes per x block (multi-MiB -> near HBM roofline), a multiple of
    # the sublane pack, and no larger than the (pack-rounded) number of rows we actually have.
    rows_by_bytes = max(pack, (target_block_bytes // (H_pad * itemsize)) // pack * pack)
    block_rows = min(rows_by_bytes, _round_up(rows, pack))
    rows_pad = _round_up(rows, block_rows)

    x2 = x.reshape(rows, H)
    if rows_pad != rows or H_pad != H:
        x2 = jnp.pad(x2, ((0, rows_pad - rows), (0, H_pad - H)))
    w2 = weight
    if H_pad != H:
        w2 = jnp.pad(w2, (0, H_pad - H))
    w2 = w2.reshape(1, H_pad)

    grid = (rows_pad // block_rows,)
    kernel = functools.partial(_rmsnorm_kernel, eps=eps, true_h=float(H))

    # VMEM budget: double-buffered input + output blocks plus f32 intermediates, with headroom,
    # clamped so it also fits comfortably inside v7x's 64 MiB per-TensorCore VMEM.
    blk_bytes = block_rows * H_pad * itemsize
    f32_blk = block_rows * H_pad * 4
    vmem_limit = int(min(max(4 * blk_bytes + 4 * f32_blk + (2 << 20), 32 << 20), 48 << 20))

    out2 = pl.pallas_call(
        kernel,
        out_shape=jax.ShapeDtypeStruct((rows_pad, H_pad), x.dtype),
        grid_spec=pltpu.PrefetchScalarGridSpec(
            num_scalar_prefetch=0,
            grid=grid,
            in_specs=[
                pl.BlockSpec((block_rows, H_pad), lambda i: (i, 0)),
                pl.BlockSpec((1, H_pad), lambda i: (0, 0)),
            ],
            out_specs=pl.BlockSpec((block_rows, H_pad), lambda i: (i, 0)),
        ),
        compiler_params=pltpu.CompilerParams(
            dimension_semantics=("parallel",),  # row axis shards across TensorCores on v7x
            vmem_limit_bytes=vmem_limit,
        ),
    )(x2, w2)

    out2 = out2[:rows, :H]
    return out2.reshape(orig_shape)


def _reference(x, weight, eps=1e-6):
    # Pure-JAX reference mirroring the PyTorch forward exactly.
    input_dtype = x.dtype
    xf = x.astype(jnp.float32)
    variance = jnp.mean(jnp.square(xf), axis=-1, keepdims=True)
    hidden = (xf * lax.rsqrt(variance + eps)).astype(input_dtype)
    return weight.astype(input_dtype) * hidden


if __name__ == "__main__":
    key = jax.random.PRNGKey(0)
    batch, seq, hidden = 2, 8, 32

    # Deterministic parameter init: module uses torch.ones(hidden_size).
    # Perturb slightly (deterministically) so the scale actually matters in the test.
    weight = jnp.ones((hidden,), dtype=jnp.float32) + 0.01 * jnp.arange(
        hidden, dtype=jnp.float32
    )

    # f32 path
    x = jax.random.normal(key, (batch, seq, hidden), dtype=jnp.float32)
    out = jax.block_until_ready(biasless_layer_norm(x, weight, eps=1e-6))
    ref = _reference(x, weight, eps=1e-6)
    assert out.shape == x.shape and out.dtype == x.dtype
    assert jnp.allclose(out, ref, atol=1e-5, rtol=1e-5)

    # bf16 path (exercises sublane packing / dtype cast-back ordering)
    xb = x.astype(jnp.bfloat16)
    outb = jax.block_until_ready(biasless_layer_norm(xb, weight, eps=1e-6))
    refb = _reference(xb, weight, eps=1e-6)
    assert outb.shape == xb.shape and outb.dtype == xb.dtype
    assert jnp.allclose(
        outb.astype(jnp.float32), refb.astype(jnp.float32), atol=2e-2, rtol=2e-2
    )

    print("KERNEL_OK")
</pallas_src>

<mosaic_0001>
module attributes {stable_mosaic.version = 11 : i64} {
  func.func @_rmsnorm_kernel(%arg0: i32, %arg1: memref<16x128xf32, #tpu.memory_space<vmem>>, %arg2: memref<1x128xf32, #tpu.memory_space<vmem>>, %arg3: memref<16x128xf32, #tpu.memory_space<vmem>>) attributes {dimension_semantics = [#tpu.dimension_semantics<parallel>], iteration_bounds = array<i64: 1>, scalar_prefetch = 0 : i64, scratch_operands = 0 : i64, tpu.core_type = #tpu.core_type<tc>, window_params = [{transform_indices = @transform_0, window_bounds = array<i64: 16, 128>}, {pipeline_mode = #tpu.pipeline_mode<synchronous>, transform_indices = @transform_1, window_bounds = array<i64: 1, 128>}, {transform_indices = @transform_2, window_bounds = array<i64: 16, 128>}]} {
    %c0 = arith.constant 0 : index
    %c0_0 = arith.constant 0 : index
    %0 = vector.load %arg1[%c0, %c0_0] : memref<16x128xf32, #tpu.memory_space<vmem>>, vector<16x128xf32>
    %1 = arith.mulf %0, %0 : vector<16x128xf32>
    %cst = arith.constant dense<0.000000e+00> : vector<16xf32>
    %2 = vector.multi_reduction <add>, %1, %cst [1] : vector<16x128xf32> to vector<16xf32>
    %3 = vector.shape_cast %2 : vector<16xf32> to vector<16x1xf32>
    %cst_1 = arith.constant 3.125000e-02 : f32
    %4 = vector.broadcast %cst_1 : f32 to vector<16x1xf32>
    %5 = arith.mulf %3, %4 : vector<16x1xf32>
    %cst_2 = arith.constant 9.99999997E-7 : f32
    %6 = vector.broadcast %cst_2 : f32 to vector<16x1xf32>
    %7 = arith.addf %5, %6 : vector<16x1xf32>
    %8 = math.rsqrt %7 : vector<16x1xf32>
    %9 = vector.broadcast %8 : vector<16x1xf32> to vector<16x128xf32>
    %10 = arith.mulf %0, %9 : vector<16x128xf32>
    %c0_3 = arith.constant 0 : index
    %c0_4 = arith.constant 0 : index
    %11 = vector.load %arg2[%c0_3, %c0_4] : memref<1x128xf32, #tpu.memory_space<vmem>>, vector<1x128xf32>
    %12 = vector.broadcast %11 : vector<1x128xf32> to vector<16x128xf32>
    %13 = arith.mulf %12, %10 : vector<16x128xf32>
    %c0_5 = arith.constant 0 : index
    %c0_6 = arith.constant 0 : index
    %14 = vector.load %arg3[%c0_5, %c0_6] : memref<16x128xf32, #tpu.memory_space<vmem>>, vector<16x128xf32>
    tpu.vector_store %arg3[%c0_5, %c0_6], %13 {strides = array<i32>} : memref<16x128xf32, #tpu.memory_space<vmem>>, vector<16x128xf32>,
    return
  }
  func.func @transform_0(%arg0: i32) -> (i32, i32) {
    %c0_i32 = arith.constant 0 : i32
    %c0_i32_0 = arith.constant 0 : i32
    return %arg0, %c0_i32 : i32, i32
  }
  func.func @transform_1(%arg0: i32) -> (i32, i32) {
    %c0_i32 = arith.constant 0 : i32
    %c0_i32_0 = arith.constant 0 : i32
    %c0_i32_1 = arith.constant 0 : i32
    return %c0_i32, %c0_i32_0 : i32, i32
  }
  func.func @transform_2(%arg0: i32) -> (i32, i32) {
    %c0_i32 = arith.constant 0 : i32
    %c0_i32_0 = arith.constant 0 : i32
    return %arg0, %c0_i32 : i32, i32
  }
}

</mosaic_0001>

<bundles_post_ra>
// kernel: tpu_custom_call.1
= control target key start
LH: loop header
LB: loop body
LE: loop exit
PB: predicated region body
PF: predicated region fallthrough
CT: control target
= control target key end

     0   :  { %7 = vsyncpa [#allocation3], 0  ;;  %s179_s0 = inlined_call_operand.hbm [shape: f32[16,128], index: 0, kind: input, shape index: {}]   ;;  %s180_s1 = inlined_call_operand.vmem [shape: f32[1,128], index: 1, kind: input, shape index: {}]   ;;  %s181_s2 = inlined_call_operand.hbm [shape: f32[16,128], index: 2, kind: output, shape index: {}]  }
   0x1   :  { %8 = vsyncpa [#allocation4], 0  ;;  %s127_s9 = smov [#allocation2]   ;;  %s79_s13 = scalar_lea.hbm %s179_s0, 256 }
   0x2   :  { %s14_s10 = sshll.u32 %s127_s9, 4  ;;  %p80_p0 = scmp.ne.s32.totalorder %s179_s0, %s79_s13  ;;  %s15_s10 = int_to_ptr.vmem [resolvable:$true] %s14_s10 }
   0x3   :  { %p83_p1 = scmp.lt.u32.totalorder %s79_s13, %s179_s0 }
   0x5   :  { %p85_p2 = pnand %p83_p1, %p80_p0 }
   0x7   :  { %88 = shalt.err (!%p85_p2)
}
   0x8   :  { %s89_s18 = scalar_lea.vmem %s15_s10, 256  ;;  %p94_p4 = scmp.lt.s32.totalorder %s15_s10, %s15_s10 }
   0x9   :  { %p90_p3 = scmp.ne.s32.totalorder %s15_s10, %s89_s18  ;;  %p95_p5 = scmp.lt.s32.totalorder %s89_s18, %s89_s18 }
   0xb   :  { %p96_p6 = por %p95_p5, %p94_p4 }
   0xd   :  { %p97_p7 = pnand %p96_p6, %p90_p3 }
   0xf   :  { %100 = shalt.err (!%p97_p7)
}
  0x10   :  { %s128_s19 = smov 128   ;;  %s129_s20 = smov 8  }
  0x11   :  { %20 = dma.hbm_to_vmem [thread:$0]  %s179_s0, 256, %s15_s10, [#allocation3], %s128_s19, %s128_s19, %s129_s20  }
  0x12   :  { %123 = dma.done.wait [#allocation3], 256  }
  0x13   :  { %124 = vsyncadd [#allocation3], 4294967040  ;;  %v26_v0 = vld [vmem:[#allocation2] sm:$0xff]  ;;  %v27_v1 = vld [vmem:[#allocation2 + $0x8] sm:$0xff]  ;;  %s130_s0 = smov [#allocation5]  }
  0x14   :  { %v28_v2 = vmul.f32 %v26_v0, %v26_v0  ;;  %v29_v3 = vmul.f32 %v27_v1, %v27_v1  ;;  %v70_v11 = vld [vmem:[%s180_s1] ss:$0 sm:$0xff]  ;;  %s58_s25 = sshll.u32 %s130_s0, 4  ;;  %s59_s25 = int_to_ptr.vmem [resolvable:$true] %s58_s25 }
  0x15   :  { %s101_s26 = scalar_lea.vmem %s59_s25, 256  ;;  %p106_p9 = scmp.lt.s32.totalorder %s59_s25, %s59_s25 }
  0x16   :  { %30 = vadd.xlane.f32.xlu0 %v28_v2  ;;  %p102_p8 = scmp.ne.s32.totalorder %s59_s25, %s101_s26  ;;  %p107_p10 = scmp.lt.s32.totalorder %s101_s26, %s101_s26 }
  0x18   :  { %p108_p11 = por %p107_p10, %p106_p9 }
  0x1a   :  { %32 = vadd.xlane.f32.xlu0 %v29_v3  ;;  %p109_p12 = pnand %p108_p11, %p102_p8 }
  0xa3   :  { %v31_v4 = vpop.xlane.xlu0 %30 }
  0xa4   :  { %v34_v5 = vmul.f32 0.03125, %v31_v4 }
  0xa6   :  { %v36_v6 = vadd.f32 1e-06, %v34_v5 }
  0xa7   :  { %v33_v7 = vpop.xlane.xlu0 %32 }
  0xa8   :  { %75 = vrsqrt.f32 %v36_v6  ;;  %v35_v8 = vmul.f32 0.03125, %v33_v7 }
  0xaa   :  { %v37_v9 = vadd.f32 1e-06, %v35_v8 }
  0xac   :  { %77 = vrsqrt.f32 %v37_v9 }
  0xb2   :  { %v76_v10 = vpop.eup %75 }
  0xb3   :  { %v40_v12 = vmul.f32 %v76_v10, %v26_v0 }
  0xb5   :  { %v49_v13 = vmul.f32 %v70_v11, %v40_v12 }
  0xb6   :  { %v78_v14 = vpop.eup %77 }
  0xb7   :  { %v41_v15 = vmul.f32 %v78_v14, %v27_v1  ;;  %51 = vst [vmem:[#allocation5] sm:$0xff] %v49_v13 }
  0xb9   :  { %v50_v16 = vmul.f32 %v70_v11, %v41_v15 }
  0xbb   :  { %52 = vst [vmem:[#allocation5 + $0x8] sm:$0xff] %v50_v16 }
  0xbc   :  { %112 = shalt.err (!%p109_p12)
}
  0xbd   :  { %s113_s1 = scalar_lea.hbm %s181_s2, 256 }
  0xbe   :  { %p114_p13 = scmp.ne.s32.totalorder %s181_s2, %s113_s1  ;;  %p117_p0 = scmp.lt.u32.totalorder %s113_s1, %s181_s2 }
  0xc0   :  { %p119_p1 = pnand %p117_p0, %p114_p13 }
  0xc2   :  { %122 = shalt.err (!%p119_p1)
}
  0xc3   :  { %64 = dma.vmem_to_hbm [thread:$0]  %s59_s25, 256, %s181_s2, [#allocation4], %s128_s19, %s128_s19, %s129_s20  }
  0xc4   :  { %125 = dma.done.wait [#allocation4], 256  }
  0xc5   :  { %126 = vsyncadd [#allocation4], 4294967040 }
  0xc6   :  { %68 = vsyncpa [#allocation3], 1 }
  0xc7   :  { %69 = vsyncpa [#allocation4], 1 }

</bundles_post_ra>
